<compile_context>
chip_gen: v6e
topology: v6e:2x2x1
jax: 0.10.0
libtpu: 0.0.40
codegen_flags: <defaults>
</compile_context>

<pallas_src>
import functools

import jax
import jax.numpy as jnp
from jax.experimental import pallas as pl
from jax.experimental.pallas import tpu as pltpu


def _attention_kernel(x_ref, w1_ref, b1_ref, w2_ref, b2_ref, o_ref, *,
                      bt, seq, matmul_dtype):
    # x_ref block: (bt*seq, F) — `bt` whole sequences of `seq` positions.
    # Linear 1 + ReLU: bf16 (or f32) inputs, f32 accumulation on the MXU.
    h = jnp.dot(x_ref[...].astype(matmul_dtype), w1_ref[...],
                preferred_element_type=jnp.float32) + b1_ref[...]        # (bt*S, A)
    h = jnp.maximum(h, 0.0)

    # Linear 2 (out_features == 1): VPU multiply + XLU lane reduction instead
    # of an N=1 MXU matmul.  b2 is a scalar read from SMEM.
    s = jnp.sum(h * w2_ref[...], axis=-1, keepdims=True) + b2_ref[0, 0]  # (bt*S, 1)

    # Softmax over the sequence axis, per sequence (== torch Softmax(dim=1)).
    # Each block holds whole sequences, so no cross-block reduction is needed.
    s = s.reshape(bt, seq, 1)
    m = jnp.max(s, axis=1, keepdims=True)                                # (bt, 1, 1)
    e = jnp.exp(s - m)
    denom = jnp.sum(e, axis=1, keepdims=True)                            # (bt, 1, 1)
    attn = (e * pl.reciprocal(denom, approx=True)).reshape(bt * seq, 1)  # (bt*S, 1)

    # Gate the input features.  Re-read x from VMEM (3 vld slots/cycle) rather
    # than keeping a (rows, F) f32 tile live across the matmul/softmax phases.
    o_ref[...] = (x_ref[...].astype(jnp.float32) * attn).astype(o_ref.dtype)


def _choose_seqs_per_block(B, S, F, itemsize, *,
                           target_block_bytes=2 << 20, min_grid_steps=8):
    """Pick how many whole sequences go in each grid block."""
    bt = int(max(1, target_block_bytes // max(1, S * F * itemsize)))
    bt = min(bt, B)
    # Keep enough grid steps for DMA/compute pipelining when the batch allows.
    while bt > 1 and (B // bt) < min_grid_steps:
        bt -= 1
    # bt must evenly divide B (uniform grid of whole sequences).
    while B % bt != 0:
        bt -= 1
    # Sublane constraint: block rows (bt*S) must be a multiple of 8 unless the
    # block covers the whole array.  Fall back to one resident block if not.
    if (bt * S) % 8 != 0 and bt * S != B * S:
        bt = B
    return bt


def attention_layer(features, w1, b1, w2, b2, *, seqs_per_block=None,
                    matmul_dtype=jnp.bfloat16, vmem_limit_bytes=64 << 20,
                    donate_features=False):
    """features: (B, S, F).  nn.Linear params: w1 (A, F), b1 (A,), w2 (1, A), b2 (1,)."""
    B, S, F = features.shape
    A = w1.shape[0]
    io_dtype = features.dtype
    itemsize = jnp.dtype(io_dtype).itemsize

    if seqs_per_block is None:
        seqs_per_block = _choose_seqs_per_block(B, S, F, itemsize)
    bt = int(seqs_per_block)
    if B % bt != 0:
        raise ValueError("seqs_per_block must divide the batch size")
    rows = bt * S                       # rows per block for the position-wise linears
    if rows % 8 != 0 and rows != B * S:
        raise ValueError("block rows (seqs_per_block * S) must be a multiple of 8")
    grid_steps = B // bt

    # Wrapper-side layout plumbing (free XLA ops): flatten batch/seq for the
    # position-wise linears, transpose W1 to (in, out); weights stay resident.
    x2d = features.reshape(B * S, F)
    w1_m = jnp.asarray(w1, jnp.float32).T.astype(matmul_dtype)           # (F, A)
    b1_r = jnp.asarray(b1, jnp.float32).reshape(1, A)
    w2_r = jnp.asarray(w2, jnp.float32).reshape(1, A)                    # row vector
    b2_r = jnp.asarray(b2, jnp.float32).reshape(1, 1)                    # SMEM scalar

    kernel = functools.partial(_attention_kernel, bt=bt, seq=S,
                               matmul_dtype=matmul_dtype)

    cost = pl.CostEstimate(
        flops=2 * B * S * F * A + 3 * B * S * A + 7 * B * S + B * S * F,
        transcendentals=B * S,
        bytes_accessed=2 * B * S * F * itemsize
        + F * A * jnp.dtype(matmul_dtype).itemsize + (2 * A + 1) * 4,
    )

    out2d = pl.pallas_call(
        kernel,
        out_shape=jax.ShapeDtypeStruct((B * S, F), io_dtype),
        grid_spec=pltpu.PrefetchScalarGridSpec(
            num_scalar_prefetch=0,
            grid=(grid_steps,),
            in_specs=[
                pl.BlockSpec((rows, F), lambda i: (i, 0)),               # feature rows
                pl.BlockSpec((F, A), lambda i: (0, 0)),                  # W1^T (resident)
                pl.BlockSpec((1, A), lambda i: (0, 0)),                  # b1
                pl.BlockSpec((1, A), lambda i: (0, 0)),                  # w2 row
                pl.BlockSpec(memory_space=pltpu.MemorySpace.SMEM),       # b2 scalar
            ],
            out_specs=pl.BlockSpec((rows, F), lambda i: (i, 0)),
        ),
        compiler_params=pltpu.CompilerParams(
            dimension_semantics=("parallel",),   # blocks are independent (whole seqs)
            vmem_limit_bytes=vmem_limit_bytes,
        ),
        cost_estimate=cost,
        input_output_aliases=({0: 0} if donate_features else {}),
    )(x2d, w1_m, b1_r, w2_r, b2_r)

    return out2d.reshape(B, S, F)


def reference(features, w1, b1, w2, b2):
    # Pure-JAX reference mirroring the PyTorch forward exactly.
    h = jnp.maximum(features @ w1.T + b1, 0.0)
    s = h @ w2.T + b2                                # (B, S, 1)
    attn = jax.nn.softmax(s, axis=1)
    return features * attn


if __name__ == "__main__":
    # batch, seq, feature_dim, attention_dim (F multiple of 128 -> lane-dense output)
    B, S, F, A = 8, 8, 128, 16

    key = jax.random.PRNGKey(0)
    k_x, k_w1, k_b1, k_w2, k_b2 = jax.random.split(key, 5)

    features = jax.random.normal(k_x, (B, S, F), dtype=jnp.float32)
    # nn.Linear-shaped parameters: W (out, in), b (out,)
    w1 = jax.random.normal(k_w1, (A, F), dtype=jnp.float32) * 0.1
    b1 = jax.random.normal(k_b1, (A,), dtype=jnp.float32) * 0.1
    w2 = jax.random.normal(k_w2, (1, A), dtype=jnp.float32) * 0.1
    b2 = jax.random.normal(k_b2, (1,), dtype=jnp.float32) * 0.1

    ref = reference(features, w1, b1, w2, b2)

    # Production path: auto row-tiled grid (>= 8 steps here), bf16 MXU inputs
    # with f32 accumulation, f32 softmax/gate.
    out = jax.block_until_ready(attention_layer(features, w1, b1, w2, b2))
    assert out.shape == (B, S, F)
    # bf16 matmul + approx reciprocal perturb the attention weights by ~1e-3
    # relative; the gate itself is f32 — loosen tolerance accordingly.
    assert jnp.allclose(out, ref, atol=2e-2, rtol=2e-2), "bf16 kernel mismatch vs reference"

    # Test-only full-precision matmul path with an explicit 4-step grid
    # (2 sequences per block).  Only the approx reciprocal remains inexact.
    out_f32 = jax.block_until_ready(
        attention_layer(features, w1, b1, w2, b2,
                        seqs_per_block=2, matmul_dtype=jnp.float32))
    assert jnp.allclose(out_f32, ref, atol=5e-3, rtol=5e-3), "f32 kernel mismatch vs reference"

    print("KERNEL_OK")
</pallas_src>

<mosaic_0001>
module attributes {stable_mosaic.version = 11 : i64} {
  func.func @_attention_kernel(%arg0: i32, %arg1: memref<8x128xf32, #tpu.memory_space<vmem>>, %arg2: memref<128x16xbf16, #tpu.memory_space<vmem>>, %arg3: memref<1x16xf32, #tpu.memory_space<vmem>>, %arg4: memref<1x16xf32, #tpu.memory_space<vmem>>, %arg5: memref<1x1xf32, #tpu.memory_space<smem>>, %arg6: memref<8x128xf32, #tpu.memory_space<vmem>>) attributes {dimension_semantics = [#tpu.dimension_semantics<parallel>], iteration_bounds = array<i64: 8>, scalar_prefetch = 0 : i64, scratch_operands = 0 : i64, tpu.core_type = #tpu.core_type<tc>, window_params = [{transform_indices = @transform_0, window_bounds = array<i64: 8, 128>}, {pipeline_mode = #tpu.pipeline_mode<synchronous>, transform_indices = @transform_1, window_bounds = array<i64: 128, 16>}, {pipeline_mode = #tpu.pipeline_mode<synchronous>, transform_indices = @transform_2, window_bounds = array<i64: 1, 16>}, {pipeline_mode = #tpu.pipeline_mode<synchronous>, transform_indices = @transform_3, window_bounds = array<i64: 1, 16>}, {transform_indices = @transform_4, window_bounds = array<i64: 1, 1>}, {transform_indices = @transform_5, window_bounds = array<i64: 8, 128>}]} {
    %c0 = arith.constant 0 : index
    %c0_0 = arith.constant 0 : index
    %0 = vector.load %arg1[%c0, %c0_0] : memref<8x128xf32, #tpu.memory_space<vmem>>, vector<8x128xf32>
    %1 = arith.truncf %0 : vector<8x128xf32> to vector<8x128xbf16>
    %c0_1 = arith.constant 0 : index
    %c0_2 = arith.constant 0 : index
    %2 = vector.load %arg2[%c0_1, %c0_2] : memref<128x16xbf16, #tpu.memory_space<vmem>>, vector<128x16xbf16>
    %cst = arith.constant dense<0.000000e+00> : vector<8x16xf32>
    %3 = tpu.matmul %1, %2, %cst {dimension_numbers = #tpu.dot_dimension_numbers<[1], [0], [0], [1], [0, 0, 1, 1], [], []>} : vector<8x128xbf16>, vector<128x16xbf16>, vector<8x16xf32> -> vector<8x16xf32>
    %c0_3 = arith.constant 0 : index
    %c0_4 = arith.constant 0 : index
    %4 = vector.load %arg3[%c0_3, %c0_4] : memref<1x16xf32, #tpu.memory_space<vmem>>, vector<1x16xf32>
    %5 = vector.broadcast %4 : vector<1x16xf32> to vector<8x16xf32>
    %6 = arith.addf %3, %5 : vector<8x16xf32>
    %cst_5 = arith.constant 0.000000e+00 : f32
    %7 = vector.broadcast %cst_5 : f32 to vector<8x16xf32>
    %8 = arith.maximumf %6, %7 : vector<8x16xf32>
    %c0_6 = arith.constant 0 : index
    %c0_7 = arith.constant 0 : index
    %9 = vector.load %arg4[%c0_6, %c0_7] : memref<1x16xf32, #tpu.memory_space<vmem>>, vector<1x16xf32>
    %10 = vector.broadcast %9 : vector<1x16xf32> to vector<8x16xf32>
    %11 = arith.mulf %8, %10 : vector<8x16xf32>
    %cst_8 = arith.constant dense<0.000000e+00> : vector<8xf32>
    %12 = vector.multi_reduction <add>, %11, %cst_8 [1] : vector<8x16xf32> to vector<8xf32>
    %13 = vector.shape_cast %12 : vector<8xf32> to vector<8x1xf32>
    %c0_9 = arith.constant 0 : index
    %c0_10 = arith.constant 0 : index
    %14 = memref.load %arg5[%c0_9, %c0_10] : memref<1x1xf32, #tpu.memory_space<smem>>
    %15 = vector.broadcast %14 : f32 to vector<8x1xf32>
    %16 = arith.addf %13, %15 : vector<8x1xf32>
    %17 = vector.shape_cast %16 : vector<8x1xf32> to vector<1x8x1xf32>
    %cst_11 = arith.constant dense<0xFF800000> : vector<1x1xf32>
    %18 = vector.multi_reduction <maximumf>, %17, %cst_11 [1] : vector<1x8x1xf32> to vector<1x1xf32>
    %19 = vector.shape_cast %18 : vector<1x1xf32> to vector<1x1x1xf32>
    %20 = vector.broadcast %19 : vector<1x1x1xf32> to vector<1x8x1xf32>
    %21 = arith.subf %17, %20 : vector<1x8x1xf32>
    %22 = math.exp %21 : vector<1x8x1xf32>
    %cst_12 = arith.constant dense<0.000000e+00> : vector<1x1xf32>
    %23 = vector.multi_reduction <add>, %22, %cst_12 [1] : vector<1x8x1xf32> to vector<1x1xf32>
    %24 = vector.shape_cast %23 : vector<1x1xf32> to vector<1x1x1xf32>
    %25 = tpu.reciprocal %24 {approx = true} : vector<1x1x1xf32> -> vector<1x1x1xf32>
    %26 = vector.broadcast %25 : vector<1x1x1xf32> to vector<1x8x1xf32>
    %27 = arith.mulf %22, %26 : vector<1x8x1xf32>
    %28 = vector.shape_cast %27 : vector<1x8x1xf32> to vector<8x1xf32>
    %c0_13 = arith.constant 0 : index
    %c0_14 = arith.constant 0 : index
    %29 = vector.load %arg1[%c0_13, %c0_14] : memref<8x128xf32, #tpu.memory_space<vmem>>, vector<8x128xf32>
    %30 = vector.broadcast %28 : vector<8x1xf32> to vector<8x128xf32>
    %31 = arith.mulf %29, %30 : vector<8x128xf32>
    %c0_15 = arith.constant 0 : index
    %c0_16 = arith.constant 0 : index
    %32 = vector.load %arg6[%c0_15, %c0_16] : memref<8x128xf32, #tpu.memory_space<vmem>>, vector<8x128xf32>
    tpu.vector_store %arg6[%c0_15, %c0_16], %31 {strides = array<i32>} : memref<8x128xf32, #tpu.memory_space<vmem>>, vector<8x128xf32>,
    return
  }
  func.func @transform_0(%arg0: i32) -> (i32, i32) {
    %c0_i32 = arith.constant 0 : i32
    %c0_i32_0 = arith.constant 0 : i32
    return %arg0, %c0_i32 : i32, i32
  }
  func.func @transform_1(%arg0: i32) -> (i32, i32) {
    %c0_i32 = arith.constant 0 : i32
    %c0_i32_0 = arith.constant 0 : i32
    %c0_i32_1 = arith.constant 0 : i32
    return %c0_i32, %c0_i32_0 : i32, i32
  }
  func.func @transform_2(%arg0: i32) -> (i32, i32) {
    %c0_i32 = arith.constant 0 : i32
    %c0_i32_0 = arith.constant 0 : i32
    %c0_i32_1 = arith.constant 0 : i32
    return %c0_i32, %c0_i32_0 : i32, i32
  }
  func.func @transform_3(%arg0: i32) -> (i32, i32) {
    %c0_i32 = arith.constant 0 : i32
    %c0_i32_0 = arith.constant 0 : i32
    %c0_i32_1 = arith.constant 0 : i32
    return %c0_i32, %c0_i32_0 : i32, i32
  }
  func.func @transform_4(%arg0: i32) -> (i32, i32) {
    %c0_i32 = arith.constant 0 : i32
    %c0_i32_0 = arith.constant 0 : i32
    %c0_i32_1 = arith.constant 0 : i32
    return %c0_i32, %c0_i32_0 : i32, i32
  }
  func.func @transform_5(%arg0: i32) -> (i32, i32) {
    %c0_i32 = arith.constant 0 : i32
    %c0_i32_0 = arith.constant 0 : i32
    return %arg0, %c0_i32 : i32, i32
  }
}

</mosaic_0001>

<bundles_post_ra>
// kernel: tpu_custom_call.1
= control target key start
LH: loop header
LB: loop body
LE: loop exit
PB: predicated region body
PF: predicated region fallthrough
CT: control target
= control target key end

     0   :  { %s760_s0 = inlined_call_operand.vmem [shape: f32[64,128], index: 0, kind: input, shape index: {}]   ;;  %s761_s1 = inlined_call_operand.vmem [shape: bf16[128,16], index: 1, kind: input, shape index: {}]   ;;  %s762_s2 = inlined_call_operand.vmem [shape: f32[1,16], index: 2, kind: input, shape index: {}]   ;;  %s763_s3 = inlined_call_operand.vmem [shape: f32[1,16], index: 3, kind: input, shape index: {}]   ;;  %s764_s4 = inlined_call_operand.<no memory space> [shape: f32[1,1], index: 4, kind: input, shape index: {}]   ;;  %s765_s5 = inlined_call_operand.hbm [shape: f32[64,128], index: 5, kind: output, shape index: {}]  }
   0x1   :  { %10 = sst [smem:[#allocation2]] %s764_s4 }
   0x2   :  { %11 = vsyncpa [#allocation4], 0 }
   0x3   :  { %13 = vsyncpa [#allocation4 + $0x1], 0  ;;  %s643_s20 = smov 0   ;;  %s645_s21 = smov 0  }
   0x4   :  { %s647_s22 = smov 0   ;;  %s649_s23 = smov 0  }
   0x5 LB: > { %s664_s4 = sadd.s32 4294967295, %s605_s23   ;;  %s443_s24 = sadd.s32 4294967294, %s605_s23   ;;  %s605_s23 = sphi %s649_s23, %s771_s23   ;;  %s601_s22 = sphi %s647_s22, %s770_s22   ;;  %s597_s21 = sphi %s645_s21, %s769_s21   ;;  %s593_s20 = sphi %s643_s20, %s768_s20  }
   0x6   : > { %s668_s25 = sadd.s32 1, %s605_s23   ;;  %s136_s26 = sadd.s32 1, %s601_s22 }
   0x7   : > { %s133_s27 = ssub.s32 %s605_s23, %s668_s25  ;;  %p146_p0 = scmp.ne.s32.totalorder %s601_s22, %s597_s21 }
   0x8   : > { %p134_p1 = scmp.eq.s32.totalorder %s133_s27, 0  ;;  %p147_p2 = scmp.eq.s32.totalorder %s664_s4, 7 }
   0x9   : > { %p152_p3 = scmp.ne.s32.totalorder %s597_s21, %s593_s20  ;;  %p153_p4 = scmp.eq.s32.totalorder %s443_s24, 7 }
   0xa   : > { %s679_s28 = scalar_select %p134_p1, %s601_s22, %s136_s26  }
   0xb   : > { %p681_p5 = por %p147_p2, %p146_p0  ;;  %p685_p6 = por %p153_p4, %p152_p3 }
   0xc   : > { %p446_p7 = scmp.ge.s32.totalorder %s605_s23, 1  ;;  %p190_p8 = scmp.lt.s32.totalorder %s605_s23, 9 }
   0xe   : > { %p191_p9 = pnand %p446_p7, %p190_p8 }
   0xf   : > { %p217_p10 = scmp.lt.s32.totalorder (!%p191_p9), %s664_s4, 7  ;;  %s348_s14 = sld [smem:[#allocation2]] (!%p191_p9) }
  0x10   : > { %194 = sbr.rel (%p191_p9) target bundleno = 467 (0x1d3), region = 40  ;;  %s214_s15 = sand.u32 (!%p191_p9), 1, %s597_s21  }
  0x11   : > { %s460_s17 = sshll.u32 (!%p191_p9), %s664_s4, 7  ;;  %s371_s6 = scalar_lea.sflag (!%p191_p9), [#allocation4], %s214_s15 }
  0x12   : > { %s382_s27 = scalar_lea.hbm (!%p191_p9), %s765_s5, %s460_s17  ;;  %s609_s8 = smov (!%p191_p9), [#allocation3]  }
  0x13   : > { %s549_s9 = sshll.u32 (!%p191_p9), %s609_s8, 4  ;;  %s550_s9 = int_to_ptr.vmem [resolvable:$false] %s549_s9 }
  0x15   : > { %v533_v0 = vld [vmem:[%s761_s1 + $0x38] sm:$0xff]   ;;  %v607_v1 = vmov 0.0   ;;  %v534_v2 = vld [vmem:[%s761_s1 + $0x30] sm:$0xff]   ;;  %vm608_vm0 = vmmov 0   ;;  %v535_v3 = vld [vmem:[%s761_s1 + $0x28] sm:$0xff]   ;;  %s218_s16 = scalar_select %p217_p10, %s664_s4, 7  ;;  %v349_v21 = vstv %s348_s14 }
  0x16   : > { %472 = vmatprep.subr.bf16.mxu0 %v607_v1  ;;  %488 = vmatprep.mubr.msk.bf16.mxu0 %vm608_vm0, %v607_v1  ;;  %v536_v4 = vld [vmem:[%s761_s1 + $0x20] sm:$0xff]   ;;  %v537_v5 = vld [vmem:[%s761_s1 + $0x18] sm:$0xff]   ;;  %v538_v6 = vld [vmem:[%s761_s1 + $0x10] sm:$0xff]   ;;  %vm344_vm1 = vcmask 130048   ;;  %s551_s4 = scalar_lea.vmem %s550_s9, 256 }
  0x17   : > { %473 = vmatpush3.bf16.msra.mxu0 %v533_v0  ;;  %s448_s19 = sshll.u32 %s218_s16, 3  ;;  %v539_v7 = vld [vmem:[%s761_s1 + $0x8] sm:$0xff]   ;;  %v540_v8 = vld [vmem:[%s761_s1] sm:$0xff]   ;;  %s447_s16 = sshll.u32 %s214_s15, 3 }
  0x18   : > { %474 = vmatprep.subr.bf16.mxu0 %v607_v1  ;;  %s220_s7 = scalar_lea.vmem %s760_s0, %s448_s19  ;;  %v449_v11 = vld [vmem:[%s762_s2] ss:$0 sm:$0xff]  ;;  %s216_s18 = scalar_lea.vmem [#allocation3], %s447_s16 }
  0x19   : > { %v222_v9 = vld [vmem:[%s220_s7] sm:$0xff]  ;;  %s384_s19 = sshll.u32 %s216_s18, 4  ;;  %s385_s19 = int_to_ptr.vmem [resolvable:$true] %s384_s19 }
  0x1a   : > { %v223_v10 = vpack.c.bf16 %v222_v9, %v222_v9  ;;  %v458_v15 = vld [vmem:[%s763_s3] ss:$0 sm:$0xff]  ;;  %s545_s7 = scalar_lea.vmem %s385_s19, 128  ;;  %p552_p0 = scmp.lt.s32.totalorder %s385_s19, %s550_s9 }
  0x1b   : > { %475 = vmatpush3.bf16.msra.mxu0 %v534_v2  ;;  %p546_p11 = scmp.ne.s32.totalorder %s385_s19, %s545_s7  ;;  %p553_p1 = scmp.lt.s32.totalorder %s551_s4, %s545_s7 }
  0x1c   : > { %476 = vmatprep.subr.bf16.mxu0 %v607_v1 }
  0x1d   : > { %p547_p12 = pnand %p546_p11, %p681_p5  ;;  %p554_p2 = por %p553_p1, %p552_p0 }
  0x1f   : > { %477 = vmatpush3.bf16.msra.mxu0 %v535_v3  ;;  %p548_p13 = pneg %p547_p12 }
  0x20   : > { %478 = vmatprep.subr.bf16.mxu0 %v607_v1 }
  0x21   : > { %p555_p3 = pnand %p554_p2, %p548_p13 }
  0x23   : > { %479 = vmatpush3.bf16.msra.mxu0 %v536_v4 }
  0x24   : > { %480 = vmatprep.subr.bf16.mxu0 %v607_v1 }
  0x27   : > { %481 = vmatpush3.bf16.msra.mxu0 %v537_v5 }
  0x28   : > { %482 = vmatprep.subr.bf16.mxu0 %v607_v1 }
  0x2b   : > { %483 = vmatpush3.bf16.msra.mxu0 %v538_v6 }
  0x2c   : > { %484 = vmatprep.subr.bf16.mxu0 %v607_v1 }
  0x2f   : > { %485 = vmatpush3.bf16.msra.mxu0 %v539_v7 }
  0x30   : > { %486 = vmatprep.subr.bf16.mxu0 %v607_v1 }
  0x33   : > { %487 = vmatpush3.bf16.msra.mxu0 %v540_v8 }
  0x36   : > { %489 = vmatmul.mubr.bf16.vlgmr.msra.gmra.mxu0 %v223_v10 }
  0xf6   : > { %v329_v12 = vpop.f32.mrf.mxu0 }
  0xf7   : > { %v330_v13 = vadd.f32 %v449_v11, %v329_v12 }
  0xf8   : > { %v490_v14 = vpop.f32.mrf.mxu0 }
  0xf9   : > { %v335_v16 = vmax.f32 %v330_v13, 0.0 }
  0xfa   : > { %v332_v17 = vpop.f32.mrf.mxu0 }
  0xfb   : > { %v343_v18 = vmul.f32 %v458_v15, %v335_v16 }
  0xfc   : > { %v491_v19 = vpop.f32.mrf.mxu0 }
  0xfd   : > { %v345_v20 = vsel %vm344_vm1, %v343_v18, 0.0 }
  0xfe   : > { %346 = vadd.xlane.f32.xlu0 %v345_v20 }
 0x187   : > { %v347_v22 = vpop.xlane.xlu0 %346 }
 0x188   : > { %v350_v23 = vadd.f32 %v349_v21, %v347_v22 }
 0x18a   : > { %v351_v24 = vrot.slane %v350_v23, 4 }
 0x18c   : > { %v352_v25 = vmax.f32 %v350_v23, %v351_v24 }
 0x18e   : > { %v353_v26 = vrot.slane %v352_v25, 2 }
 0x190   : > { %v354_v27 = vmax.f32 %v352_v25, %v353_v26 }
 0x192   : > { %v355_v28 = vrot.slane %v354_v27, 1 }
 0x194   : > { %v356_v29 = vmax.f32 %v354_v27, %v355_v28 }
 0x196   : > { %v357_v30 = vsub.f32 %v350_v23, %v356_v29 }
 0x198   : > { %v358_v31 = vmul.f32 1.442695, %v357_v30 }
 0x19a   : > { %541 = vpow2.f32 %v358_v31 }
 0x1a7   : > { %v542_v32 = vpop.eup %541 }
 0x1a8   : > { %v360_v33 = vrot.slane %v542_v32, 4 }
 0x1aa   : > { %v361_v34 = vadd.f32 %v542_v32, %v360_v33 }
 0x1ac   : > { %v362_v35 = vrot.slane %v361_v34, 2 }
 0x1ae   : > { %v363_v36 = vadd.f32 %v362_v35, %v361_v34 }
 0x1b0   : > { %v364_v37 = vrot.slane %v363_v36, 1 }
 0x1b2   : > { %v365_v38 = vadd.f32 %v364_v37, %v363_v36 }
 0x1b4   : > { %543 = vrcp.f32 %v365_v38 }
 0x1c1   : > { %v544_v39 = vpop.eup %543 }
 0x1c2   : > { %v367_v40 = vmul.f32 %v544_v39, %v542_v32 }
 0x1c4   : > { %v368_v41 = vmul.f32 %v367_v40, %v222_v9 }
 0x1c6   : > { %369 = vst [vmem:[%s216_s18] sm:$0xff] %v368_v41 }
 0x1c7   : > { %558 = shalt.err (!%p555_p3)
}
 0x1c8   : > { %s559_s10 = scalar_lea.hbm %s382_s27, 128  ;;  %s563_s13 = scalar_lea.hbm %s765_s5, 1024 }
 0x1c9   : > { %p560_p4 = scmp.ne.s32.totalorder %s382_s27, %s559_s10  ;;  %p564_p9 = scmp.lt.s32.totalorder %s382_s27, %s765_s5 }
 0x1ca   : > { %p565_p10 = scmp.lt.s32.totalorder %s563_s13, %s559_s10 }
 0x1cb   : > { %p561_p7 = pnand %p560_p4, %p681_p5 }
 0x1cc   : > { %p566_p11 = por %p565_p10, %p564_p9 }
 0x1cd   : > { %p562_p8 = pneg %p561_p7 }
 0x1cf   : > { %p567_p12 = pnand %p566_p11, %p562_p8 }
 0x1d1   : > { %570 = shalt.err (!%p567_p12)
}
 0x1d2   : > { %492 = dma.vmem_to_hbm [thread:$0]  (%p681_p5), %s385_s19, 128, %s382_s27, %s371_s6  }
 0x1d3 PF: > { %p498_p13 = scmp.ge.s32.totalorder %s605_s23, 2  ;;  %s396_s16 = sand.u32 1, %s593_s20  }
 0x1d4   : > { %s397_s17 = scalar_lea.sflag [#allocation4], %s396_s16 }
 0x1d5   : > { %p495_p0 = pnand %p498_p13, %p685_p6 }
 0x1d7   : > { %p496_p1 = pneg %p495_p0 }
 0x1d9   : > { %588 = dma.done.wait (%p496_p1), %s397_s17, 128  }
 0x1da   : > { %590 = vsyncadd (%p496_p1), %s397_s17, 4294967168  ;;  %p16_p2 = scmp.ge.s32.totalorder %s668_s25, 10   ;;  %s768_s20 = smov %s597_s21 }
 0x1db   : > { %s769_s21 = smov %s601_s22  ;;  %s770_s22 = smov %s679_s28 }
 0x1dc   : > { %s771_s23 = smov %s668_s25  ;;  %18 = sbr.rel (!%p16_p2) target bundleno = 5 (0x5), region = 75 }
 0x1e1   :  { %402 = vsyncpa [#allocation4], 1 }
 0x1e2   :  { %404 = vsyncpa [#allocation4 + $0x1], 1 }

</bundles_post_ra>
